<compile_context>
chip_gen: v6e
topology: v6e:2x2x1
jax: 0.10.0
libtpu: 0.0.40
codegen_flags: <defaults>
</compile_context>

<pallas_src>
import functools

import jax
import jax.numpy as jnp
from jax.experimental import pallas as pl
from jax.experimental.pallas import tpu as pltpu


# ----------------------------- Pallas kernel -------------------------------

def _mlp_kernel(x_ref, w1_ref, b1_ref, w2_ref, b2_ref, o_ref):
    # x_ref : (tile_m, dim)      f32
    # w1_ref: (dim, hidden)      bf16     b1_ref: (1, hidden) f32
    # w2_ref: (hidden, dim)      bf16     b2_ref: (1, dim)    f32
    # o_ref : (tile_m, dim)      f32
    x = x_ref[...]

    # fc1: bf16 inputs on the MXU, f32 accumulation, f32 bias add.
    h = jnp.dot(x.astype(jnp.bfloat16), w1_ref[...],
                preferred_element_type=jnp.float32) + b1_ref[...]

    # exact (erf-based) GELU in f32, matching nn.GELU() default.
    h = 0.5 * h * (1.0 + jax.lax.erf(h * (2.0 ** -0.5)))

    # TODO(synk): dropout is identity here (inference semantics).

    # fc2: bf16 inputs, f32 accumulation, f32 bias add. Lane-dense store.
    y = jnp.dot(h.astype(jnp.bfloat16), w2_ref[...],
                preferred_element_type=jnp.float32) + b2_ref[...]
    o_ref[...] = y.astype(o_ref.dtype)


# ------------------------------ JAX wrapper ---------------------------------

def _choose_tile_m(M):
    # Prefer MXU/HBM-friendly row tiles but keep >=2 grid steps so both
    # TensorCores on v7x get work via the "parallel" grid axis.
    for t in (512, 256, 128, 64, 32, 16, 8):
        if M % t == 0 and M // t >= 2:
            return t
    return M  # tiny/odd M: single grid step fallback


def mlp_forward(x, params):
    """x: (B, n_patches, dim) f32 -> (B, n_patches, dim) f32."""
    B, N, D = x.shape
    hidden = params['fc1_w'].shape[-1]
    M = B * N
    x2 = x.reshape(M, D)

    tile_m = _choose_tile_m(M)
    grid = (pl.cdiv(M, tile_m),)

    out2 = pl.pallas_call(
        _mlp_kernel,
        out_shape=jax.ShapeDtypeStruct((M, D), x.dtype),
        grid=grid,
        in_specs=[
            pl.BlockSpec((tile_m, D), lambda i: (i, 0)),        # x rows
            pl.BlockSpec((D, hidden), lambda i: (0, 0)),        # fc1 w (bf16)
            pl.BlockSpec((1, hidden), lambda i: (0, 0)),        # fc1 b (f32)
            pl.BlockSpec((hidden, D), lambda i: (0, 0)),        # fc2 w (bf16)
            pl.BlockSpec((1, D), lambda i: (0, 0)),             # fc2 b (f32)
        ],
        out_specs=pl.BlockSpec((tile_m, D), lambda i: (i, 0)),
        compiler_params=pltpu.CompilerParams(
            dimension_semantics=("parallel",),
            vmem_limit_bytes=48 * 1024 * 1024,
        ),
    )(x2, params['fc1_w'], params['fc1_b'], params['fc2_w'], params['fc2_b'])

    return out2.reshape(B, N, D)


# --------------------------- deterministic params ---------------------------

def init_params(key, *, dim, hidden_dim):
    k1, k2, k3, k4 = jax.random.split(key, 4)
    # Weights pre-transposed to (in_features, out_features); stored in bf16
    # for MXU-friendly matmuls. Biases stay f32 (added after f32 accumulation).
    fc1_w = (jax.random.normal(k1, (dim, hidden_dim), jnp.float32) * 0.02
             ).astype(jnp.bfloat16)
    fc1_b = jax.random.normal(k2, (1, hidden_dim), jnp.float32) * 0.02
    fc2_w = (jax.random.normal(k3, (hidden_dim, dim), jnp.float32) * 0.02
             ).astype(jnp.bfloat16)
    fc2_b = jax.random.normal(k4, (1, dim), jnp.float32) * 0.02
    return dict(fc1_w=fc1_w, fc1_b=fc1_b, fc2_w=fc2_w, fc2_b=fc2_b)


# ---------------------------------- main -------------------------------------

if __name__ == "__main__":
    B, N = 2, 16                 # batch, n_patches
    dim, hidden_dim = 128, 512   # lane-dense output; hidden is a 256-multiple

    key = jax.random.PRNGKey(0)
    k_x, k_p = jax.random.split(key)
    x = jax.random.normal(k_x, (B, N, dim), jnp.float32)
    params = init_params(k_p, dim=dim, hidden_dim=hidden_dim)

    fwd = jax.jit(mlp_forward)
    out = fwd(x, params)
    jax.block_until_ready(out)

    assert out.shape == (B, N, dim)
    assert bool(jnp.all(jnp.isfinite(out)))
    print("KERNEL_OK")
</pallas_src>

<mosaic_0001>
module attributes {stable_mosaic.version = 11 : i64} {
  func.func @_mlp_kernel(%arg0: i32, %arg1: memref<16x128xf32, #tpu.memory_space<vmem>>, %arg2: memref<128x512xbf16, #tpu.memory_space<vmem>>, %arg3: memref<1x512xf32, #tpu.memory_space<vmem>>, %arg4: memref<512x128xbf16, #tpu.memory_space<vmem>>, %arg5: memref<1x128xf32, #tpu.memory_space<vmem>>, %arg6: memref<16x128xf32, #tpu.memory_space<vmem>>) attributes {dimension_semantics = [#tpu.dimension_semantics<parallel>], iteration_bounds = array<i64: 2>, scalar_prefetch = 0 : i64, scratch_operands = 0 : i64, tpu.core_type = #tpu.core_type<tc>, window_params = [{transform_indices = @transform_0, window_bounds = array<i64: 16, 128>}, {pipeline_mode = #tpu.pipeline_mode<synchronous>, transform_indices = @transform_1, window_bounds = array<i64: 128, 512>}, {pipeline_mode = #tpu.pipeline_mode<synchronous>, transform_indices = @transform_2, window_bounds = array<i64: 1, 512>}, {pipeline_mode = #tpu.pipeline_mode<synchronous>, transform_indices = @transform_3, window_bounds = array<i64: 512, 128>}, {pipeline_mode = #tpu.pipeline_mode<synchronous>, transform_indices = @transform_4, window_bounds = array<i64: 1, 128>}, {transform_indices = @transform_5, window_bounds = array<i64: 16, 128>}]} {
    %c0 = arith.constant 0 : index
    %c0_0 = arith.constant 0 : index
    %0 = vector.load %arg1[%c0, %c0_0] : memref<16x128xf32, #tpu.memory_space<vmem>>, vector<16x128xf32>
    %1 = arith.truncf %0 : vector<16x128xf32> to vector<16x128xbf16>
    %c0_1 = arith.constant 0 : index
    %c0_2 = arith.constant 0 : index
    %2 = vector.load %arg2[%c0_1, %c0_2] : memref<128x512xbf16, #tpu.memory_space<vmem>>, vector<128x512xbf16>
    %cst = arith.constant dense<0.000000e+00> : vector<16x512xf32>
    %3 = tpu.matmul %1, %2, %cst {dimension_numbers = #tpu.dot_dimension_numbers<[1], [0], [0], [1], [0, 0, 1, 1], [], []>} : vector<16x128xbf16>, vector<128x512xbf16>, vector<16x512xf32> -> vector<16x512xf32>
    %c0_3 = arith.constant 0 : index
    %c0_4 = arith.constant 0 : index
    %4 = vector.load %arg3[%c0_3, %c0_4] : memref<1x512xf32, #tpu.memory_space<vmem>>, vector<1x512xf32>
    %5 = vector.broadcast %4 : vector<1x512xf32> to vector<16x512xf32>
    %6 = arith.addf %3, %5 : vector<16x512xf32>
    %cst_5 = arith.constant 5.000000e-01 : f32
    %7 = vector.broadcast %cst_5 : f32 to vector<16x512xf32>
    %8 = arith.mulf %7, %6 : vector<16x512xf32>
    %cst_6 = arith.constant 0.707106769 : f32
    %9 = vector.broadcast %cst_6 : f32 to vector<16x512xf32>
    %10 = arith.mulf %6, %9 : vector<16x512xf32>
    %11 = math.erf %10 : vector<16x512xf32>
    %cst_7 = arith.constant 1.000000e+00 : f32
    %12 = vector.broadcast %cst_7 : f32 to vector<16x512xf32>
    %13 = arith.addf %12, %11 : vector<16x512xf32>
    %14 = arith.mulf %8, %13 : vector<16x512xf32>
    %15 = arith.truncf %14 : vector<16x512xf32> to vector<16x512xbf16>
    %c0_8 = arith.constant 0 : index
    %c0_9 = arith.constant 0 : index
    %16 = vector.load %arg4[%c0_8, %c0_9] : memref<512x128xbf16, #tpu.memory_space<vmem>>, vector<512x128xbf16>
    %cst_10 = arith.constant dense<0.000000e+00> : vector<16x128xf32>
    %17 = tpu.matmul %15, %16, %cst_10 {dimension_numbers = #tpu.dot_dimension_numbers<[1], [0], [0], [1], [0, 0, 1, 1], [], []>} : vector<16x512xbf16>, vector<512x128xbf16>, vector<16x128xf32> -> vector<16x128xf32>
    %c0_11 = arith.constant 0 : index
    %c0_12 = arith.constant 0 : index
    %18 = vector.load %arg5[%c0_11, %c0_12] : memref<1x128xf32, #tpu.memory_space<vmem>>, vector<1x128xf32>
    %19 = vector.broadcast %18 : vector<1x128xf32> to vector<16x128xf32>
    %20 = arith.addf %17, %19 : vector<16x128xf32>
    %c0_13 = arith.constant 0 : index
    %c0_14 = arith.constant 0 : index
    %21 = vector.load %arg6[%c0_13, %c0_14] : memref<16x128xf32, #tpu.memory_space<vmem>>, vector<16x128xf32>
    tpu.vector_store %arg6[%c0_13, %c0_14], %20 {strides = array<i32>} : memref<16x128xf32, #tpu.memory_space<vmem>>, vector<16x128xf32>,
    return
  }
  func.func @transform_0(%arg0: i32) -> (i32, i32) {
    %c0_i32 = arith.constant 0 : i32
    %c0_i32_0 = arith.constant 0 : i32
    return %arg0, %c0_i32 : i32, i32
  }
  func.func @transform_1(%arg0: i32) -> (i32, i32) {
    %c0_i32 = arith.constant 0 : i32
    %c0_i32_0 = arith.constant 0 : i32
    %c0_i32_1 = arith.constant 0 : i32
    return %c0_i32, %c0_i32_0 : i32, i32
  }
  func.func @transform_2(%arg0: i32) -> (i32, i32) {
    %c0_i32 = arith.constant 0 : i32
    %c0_i32_0 = arith.constant 0 : i32
    %c0_i32_1 = arith.constant 0 : i32
    return %c0_i32, %c0_i32_0 : i32, i32
  }
  func.func @transform_3(%arg0: i32) -> (i32, i32) {
    %c0_i32 = arith.constant 0 : i32
    %c0_i32_0 = arith.constant 0 : i32
    %c0_i32_1 = arith.constant 0 : i32
    return %c0_i32, %c0_i32_0 : i32, i32
  }
  func.func @transform_4(%arg0: i32) -> (i32, i32) {
    %c0_i32 = arith.constant 0 : i32
    %c0_i32_0 = arith.constant 0 : i32
    %c0_i32_1 = arith.constant 0 : i32
    return %c0_i32, %c0_i32_0 : i32, i32
  }
  func.func @transform_5(%arg0: i32) -> (i32, i32) {
    %c0_i32 = arith.constant 0 : i32
    %c0_i32_0 = arith.constant 0 : i32
    return %arg0, %c0_i32 : i32, i32
  }
}

</mosaic_0001>

<bundles_post_ra>
// kernel: mlp_forward.1
= control target key start
LH: loop header
LB: loop body
LE: loop exit
PB: predicated region body
PF: predicated region fallthrough
CT: control target
= control target key end

     0   :  { %10 = vsyncpa [#allocation3], 0  ;;  %s1846_s0 = inlined_call_operand.hbm [shape: f32[32,128], index: 0, kind: input, shape index: {}]   ;;  %s1847_s1 = inlined_call_operand.hbm [shape: bf16[128,512], index: 1, kind: input, shape index: {}]   ;;  %s1848_s2 = inlined_call_operand.hbm [shape: f32[1,512], index: 2, kind: input, shape index: {}]   ;;  %s1849_s3 = inlined_call_operand.hbm [shape: bf16[512,128], index: 3, kind: input, shape index: {}]   ;;  %s1850_s4 = inlined_call_operand.vmem [shape: f32[1,128], index: 4, kind: input, shape index: {}]   ;;  %s1851_s5 = inlined_call_operand.hbm [shape: f32[32,128], index: 5, kind: output, shape index: {}]  }
   0x1   :  { %12 = vsyncpa [#allocation3 + $0x1], 0 }
   0x2   :  { %13 = vsyncpa [#allocation6], 0 }
   0x3   :  { %14 = vsyncpa [#allocation9], 0 }
   0x4   :  { %15 = vsyncpa [#allocation4], 0 }
   0x5   :  { %17 = vsyncpa [#allocation4 + $0x1], 0  ;;  %s1635_s18 = smov 0   ;;  %s1637_s19 = smov 0  }
   0x6   :  { %s1639_s20 = smov 0   ;;  %s1641_s21 = smov 0  }
   0x7 LB: > { %s1656_s22 = sadd.s32 4294967295, %s1589_s21   ;;  %s1098_s23 = sadd.s32 4294967294, %s1589_s21   ;;  %s1589_s21 = sphi %s1641_s21, %s1875_s21   ;;  %s1585_s20 = sphi %s1639_s20, %s1874_s20   ;;  %s1581_s19 = sphi %s1637_s19, %s1873_s19   ;;  %s1577_s18 = sphi %s1635_s18, %s1872_s18  }
   0x8   : > { %p43_p0 = scmp.ne.s32.totalorder %s1581_s19, %s1577_s18  ;;  %p1852_p1 = scmp.eq.s32.totalorder %s1656_s22, 0 }
   0x9   : > { %p157_p3 = scmp.eq.s32.totalorder %s1098_s23, 1  ;;  %p1099_p5 = scmp.ge.s32.totalorder %s1589_s21, 1 }
   0xa   : > { %p1665_p4 = por %p1852_p1, %p43_p0  ;;  %p164_p7 = scmp.lt.s32.totalorder %s1589_s21, 3 }
   0xb   : > { %p1670_p6 = por %p157_p3, %p43_p0  ;;  %s1591_s27 = smov [#allocation5]  }
   0xc   : > { %s1856_s24 = scalar_select %p1665_p4, 1, 0 }
   0xd   : > { %s1857_s25 = scalar_select %p1670_p6, 1, 0 }
   0xe   : > { %p1675_p8 = pnand %p1099_p5, %p164_p7  ;;  %s176_s28 = sshll.u32 %s1591_s27, 4  ;;  %s177_s28 = int_to_ptr.vmem [resolvable:$true] %s176_s28 }
   0xf   : > { %s1592_s30 = smov [#allocation7]   ;;  %s1593_s7 = smov [#allocation8]  }
  0x10   : > { %s1858_s26 = scalar_select %p1675_p8, 1, 0 }
  0x11   : > { %p1245_p9 = pneg %p1675_p8  ;;  %s190_s6 = sshll.u32 %s1592_s30, 4  ;;  %s191_s6 = int_to_ptr.vmem [resolvable:$true] %s190_s6 }
  0x12   : > { %s200_s8 = sshll.u32 %s1593_s7, 4  ;;  %s1422_s9 = scalar_lea.vmem %s177_s28, 4096  ;;  %s201_s8 = int_to_ptr.vmem [resolvable:$true] %s200_s8 }
  0x13   : > { %p1684_p11 = pnand %p1245_p9, %p1852_p1  ;;  %p1423_p13 = scmp.ne.s32.totalorder %s177_s28, %s1422_s9 }
  0x14   : > { %p1430_p5 = scmp.lt.s32.totalorder %s177_s28, %s177_s28  ;;  %p1431_p7 = scmp.lt.s32.totalorder %s1422_s9, %s1422_s9 }
  0x15   : > { %p1413_p12 = pneg %p1684_p11 }
  0x16   : > { %p1432_p9 = por %p1431_p7, %p1430_p5 }
  0x17   : > { %p1425_p0 = pnand %p1423_p13, %p1413_p12 }
  0x19   : > { %p1426_p3 = pneg %p1425_p0 }
  0x1b   : > { %p1433_p10 = pnand %p1432_p9, %p1426_p3 }
  0x1d   : > { %1436 = shalt.err (!%p1433_p10)
}
  0x1e   : > { %s1594_s10 = smov 256   ;;  %s1595_s11 = smov 16  }
  0x1f   : > { %1248 = dma.hbm_to_vmem [thread:$0]  (!%p1684_p11), %s1847_s1, 4096, %s177_s28, [#allocation6], %s1594_s10, %s1594_s10, %s1595_s11  }
  0x20   : > { %s1448_s14 = scalar_lea.vmem %s191_s6, 64  ;;  %p1456_p2 = scmp.lt.s32.totalorder %s191_s6, %s191_s6 }
  0x21   : > { %p1449_p1 = scmp.ne.s32.totalorder %s191_s6, %s1448_s14  ;;  %p1457_p6 = scmp.lt.s32.totalorder %s1448_s14, %s1448_s14 }
  0x23   : > { %p1451_p13 = pnand %p1449_p1, %p1413_p12  ;;  %p1458_p5 = por %p1457_p6, %p1456_p2 }
  0x25   : > { %p1452_p0 = pneg %p1451_p13 }
  0x27   : > { %p1459_p3 = pnand %p1458_p5, %p1452_p0 }
  0x29   : > { %1462 = shalt.err (!%p1459_p3)
}
  0x2a   : > { %1251 = dma.hbm_to_vmem [thread:$0]  (!%p1684_p11), %s1848_s2, 64, %s191_s6, [#allocation6]  }
  0x2b   : > { %s1474_s17 = scalar_lea.vmem %s201_s8, 4096  ;;  %p1482_p9 = scmp.lt.s32.totalorder %s201_s8, %s201_s8 }
  0x2c   : > { %p1475_p10 = scmp.ne.s32.totalorder %s201_s8, %s1474_s17  ;;  %p1483_p13 = scmp.lt.s32.totalorder %s1474_s17, %s1474_s17 }
  0x2e   : > { %p1477_p7 = pnand %p1475_p10, %p1413_p12  ;;  %p1484_p4 = por %p1483_p13, %p1482_p9 }
  0x30   : > { %p1478_p1 = pneg %p1477_p7 }
  0x32   : > { %p1485_p2 = pnand %p1484_p4, %p1478_p1 }
  0x34   : > { %1488 = shalt.err (!%p1485_p2)
}
  0x35   : > { %s1596_s23 = smov 64   ;;  %s1597_s27 = smov 4  }
  0x36   : > { %1254 = dma.hbm_to_vmem [thread:$0]  (!%p1684_p11), %s1849_s3, 4096, %s201_s8, [#allocation9], %s1596_s23, %s1596_s23, %s1597_s27  }
  0x37   : > { %s1715_s6 = sadd.s32 1, %s1589_s21   ;;  %s30_s9 = sadd.s32 1, %s1585_s20 }
  0x38   : > { %s27_s7 = ssub.s32 %s1589_s21, %s1715_s6  ;;  %p37_p6 = scmp.ne.s32.totalorder %s1585_s20, %s1581_s19 }
  0x39   : > { %p28_p4 = scmp.eq.s32.totalorder %s27_s7, 0  ;;  %p38_p12 = scmp.eq.s32.totalorder %s1589_s21, 0 }
  0x3a   : > { %p1266_p0 = scmp.lt.s32.totalorder %s1589_s21, 2  ;;  %p1860_p3 = scmp.eq.s32.totalorder %s1656_s22, 1 }
  0x3b   : > { %s1725_s10 = scalar_select %p28_p4, %s1585_s20, %s30_s9  }
  0x3c   : > { %p39_p5 = por %p38_p12, %p37_p6  ;;  %p1729_p10 = por %p1860_p3, %p37_p6 }
  0x3d   : > { %s217_s29 = sand.u32 1, %s1585_s20   ;;  %s1183_s12 = sshll.u32 %s1589_s21, 8 }
  0x3e   : > { %s1861_s11 = scalar_select %p1729_p10, 1, 0 }
  0x3f   : > { %s1104_s8 = sshll.u32 %s217_s29, 4  ;;  %s1738_s15 = scalar_lea.hbm %s1846_s0, %s1183_s12 }
  0x40   : > { %s221_s16 = scalar_lea.vmem [#allocation2], %s1104_s8  ;;  %p1740_p11 = pnand %p1266_p0, %p39_p5 }
  0x41   : > { %s228_s17 = sshll.u32 %s221_s16, 4  ;;  %s1746_s27 = scalar_lea.sflag [#allocation3], %s217_s29  ;;  %s1744_s17 = int_to_ptr.vmem [resolvable:$true] %s228_s17 }
  0x42   : > { %s1489_s28 = scalar_lea.hbm %s1738_s15, 256  ;;  %p1491_p1 = pneg %p1740_p11 }
  0x43   : > { %p1490_p7 = scmp.ne.s32.totalorder %s1738_s15, %s1489_s28  ;;  %s1494_s9 = scalar_lea.hbm %s1846_s0, 512 }
  0x44   : > { %p1495_p2 = scmp.lt.s32.totalorder %s1738_s15, %s1846_s0  ;;  %p1496_p4 = scmp.lt.s32.totalorder %s1494_s9, %s1489_s28 }
  0x45   : > { %p1492_p9 = pnand %p1491_p1, %p1490_p7 }
  0x46   : > { %p1497_p6 = por %p1496_p4, %p1495_p2 }
  0x47   : > { %p1493_p13 = pneg %p1492_p9 }
  0x49   : > { %p1498_p12 = pnand %p1497_p6, %p1493_p13 }
  0x4b   : > { %1501 = shalt.err (!%p1498_p12)
}
  0x4c   : > { %s1502_s29 = scalar_lea.vmem %s1744_s17, 256  ;;  %s1598_s13 = smov [#allocation2]  }
  0x4d   : > { %p1503_p0 = scmp.ne.s32.totalorder %s1744_s17, %s1502_s29  ;;  %s1507_s14 = sshll.u32 %s1598_s13, 4  ;;  %s1508_s14 = int_to_ptr.vmem [resolvable:$false] %s1507_s14 }
  0x4e   : > { %s1509_s16 = scalar_lea.vmem %s1508_s14, 512  ;;  %p1510_p7 = scmp.lt.s32.totalorder %s1744_s17, %s1508_s14 }
  0x4f   : > { %p1505_p5 = pnand %p1503_p0, %p1491_p1  ;;  %p1511_p9 = scmp.lt.s32.totalorder %s1509_s16, %s1502_s29 }
  0x51   : > { %p1506_p3 = pneg %p1505_p5  ;;  %p1512_p10 = por %p1511_p9, %p1510_p7 }
  0x53   : > { %p1513_p8 = pnand %p1512_p10, %p1506_p3 }
  0x55   : > { %1516 = shalt.err (!%p1513_p8)
}
  0x56   : > { %s1599_s28 = smov 128   ;;  %s1600_s30 = smov 8  }
  0x57   : > { %1258 = dma.hbm_to_vmem [thread:$0]  (!%p1740_p11), %s1738_s15, 256, %s1744_s17, %s1746_s27, %s1599_s28, %s1599_s28, %s1600_s30  }
  0x58   : > { %p1863_p1 = scmp.ne.s32.totalorder %s1858_s26, 0 }
  0x59   : > { %s1770_s7 = sand.u32 (!%p1863_p1), 1, %s1581_s19   ;;  %p1864_p8 = scmp.ne.s32.totalorder (!%p1863_p1), %s1856_s24, 0 }
  0x5a   : > { %240 = sbr.rel (%p1863_p1) target bundleno = 579 (0x243), region = 40  ;;  %s1108_s9 = sshll.u32 (!%p1863_p1), %s1770_s7, 4 }
  0x5b   : > { %s243_s12 = scalar_lea.sflag (!%p1863_p1), [#allocation3], %s1770_s7  ;;  %s1776_s8 = scalar_lea.vmem (!%p1863_p1), [#allocation2], %s1108_s9 }
  0x5f   : > { %1560 = dma.done.wait (%p1864_p8), %s243_s12, 256  }
  0x60   : > { %1562 = vsyncadd (%p1864_p8), %s243_s12, 4294967040  ;;  %p1865_p10 = scmp.eq.s32.totalorder %s1656_s22, 0 }
  0x62   : > { %1564 = dma.done.wait (%p1865_p10), [#allocation6], 4160   ;;  %p1866_p11 = pmov %p1865_p10 }
  0x63   : > { %p1867_p13 = pmov %p1865_p10 }
  0x64   : > { %1566 = vsyncadd (%p1866_p11), [#allocation6], 4294963136 }
  0x65   : > { %1568 = dma.done.wait (%p1867_p13), [#allocation9], 4096   ;;  %p1868_p2 = pmov %p1865_p10 }
  0x66   : > { %v1601_v0 = vmov 0   ;;  %v1315_v1 = vld [vmem:[#allocation5 + $0xe4] ss:$16 sps:$4 sm:$0xff]   ;;  %v1317_v2 = vld [vmem:[#allocation5 + $0xec] ss:$16 sps:$4 sm:$0xff]   ;;  %s284_s15 = scalar_lea.vmem [#allocation10], %s1108_s9 }
  0x67   : > { %1570 = vsyncadd (%p1868_p2), [#allocation9], 4294963200  ;;  %537 = vmatprep.mubr.bf16.mxu0 %v1601_v0  ;;  %580 = vmatprep.mubr.bf16.mxu1 %v1601_v0  ;;  %v1319_v3 = vld [vmem:[#allocation5 + $0xe0] ss:$16 sps:$4 sm:$0xff]   ;;  %v1320_v4 = vld [vmem:[#allocation5 + $0xe8] ss:$16 sps:$4 sm:$0xff]  }
  0x68   : > { %505 = vmatprep.subr.bf16.mxu0 %v1315_v1  ;;  %548 = vmatprep.subr.bf16.mxu1 %v1317_v2  ;;  %v1321_v5 = vld [vmem:[#allocation5 + $0xc4] ss:$16 sps:$4 sm:$0xff]   ;;  %v1323_v6 = vld [vmem:[#allocation5 + $0xcc] ss:$16 sps:$4 sm:$0xff]   ;;  %v1325_v7 = vld [vmem:[#allocation5 + $0xc0] ss:$16 sps:$4 sm:$0xff]  }
  0x69   : > { %506 = vmatpush1.bf16.msra.mxu0 %v1319_v3  ;;  %549 = vmatpush1.bf16.msra.mxu1 %v1320_v4  ;;  %v1326_v8 = vld [vmem:[#allocation5 + $0xc8] ss:$16 sps:$4 sm:$0xff]   ;;  %v1327_v9 = vld [vmem:[#allocation5 + $0xa4] ss:$16 sps:$4 sm:$0xff]   ;;  %v1329_v10 = vld [vmem:[#allocation5 + $0xac] ss:$16 sps:$4 sm:$0xff]   ;;  %v325_v4 = vlaneseq }
  0x6a   : > { %507 = vmatprep.subr.bf16.mxu0 %v1321_v5  ;;  %550 = vmatprep.subr.bf16.mxu1 %v1323_v6  ;;  %v1331_v11 = vld [vmem:[#allocation5 + $0xa0] ss:$16 sps:$4 sm:$0xff]   ;;  %v1332_v12 = vld [vmem:[#allocation5 + $0xa8] ss:$16 sps:$4 sm:$0xff]   ;;  %v1333_v13 = vld [vmem:[#allocation5 + $0x84] ss:$16 sps:$4 sm:$0xff]  }
  0x6b   : > { %v1335_v14 = vld [vmem:[#allocation5 + $0x8c] ss:$16 sps:$4 sm:$0xff]   ;;  %v1337_v15 = vld [vmem:[#allocation5 + $0x80] ss:$16 sps:$4 sm:$0xff]   ;;  %v1338_v16 = vld [vmem:[#allocation5 + $0x88] ss:$16 sps:$4 sm:$0xff]  }
  0x6c   : > { %v1339_v17 = vld [vmem:[#allocation5 + $0x64] ss:$16 sps:$4 sm:$0xff]   ;;  %v1341_v18 = vld [vmem:[#allocation5 + $0x6c] ss:$16 sps:$4 sm:$0xff]   ;;  %v1343_v19 = vld [vmem:[#allocation5 + $0x60] ss:$16 sps:$4 sm:$0xff]  }
  0x6d   : > { %508 = vmatpush1.bf16.msra.mxu0 %v1325_v7  ;;  %551 = vmatpush1.bf16.msra.mxu1 %v1326_v8  ;;  %v1344_v20 = vld [vmem:[#allocation5 + $0x68] ss:$16 sps:$4 sm:$0xff]   ;;  %v1345_v21 = vld [vmem:[#allocation5 + $0x44] ss:$16 sps:$4 sm:$0xff]   ;;  %v1347_v22 = vld [vmem:[#allocation5 + $0x4c] ss:$16 sps:$4 sm:$0xff]  }
  0x6e   : > { %509 = vmatprep.subr.bf16.mxu0 %v1327_v9  ;;  %552 = vmatprep.subr.bf16.mxu1 %v1329_v10  ;;  %v1349_v23 = vld [vmem:[#allocation5 + $0x40] ss:$16 sps:$4 sm:$0xff]   ;;  %v1350_v24 = vld [vmem:[#allocation5 + $0x48] ss:$16 sps:$4 sm:$0xff]   ;;  %v1351_v25 = vld [vmem:[#allocation5 + $0x24] ss:$16 sps:$4 sm:$0xff]  }
  0x6f   : > { %v1353_v26 = vld [vmem:[#allocation5 + $0x2c] ss:$16 sps:$4 sm:$0xff]   ;;  %v1355_v27 = vld [vmem:[#allocation5 + $0x20] ss:$16 sps:$4 sm:$0xff]   ;;  %v1356_v28 = vld [vmem:[#allocation5 + $0x28] ss:$16 sps:$4 sm:$0xff]  }
  0x70   : > { %v1357_v29 = vld [vmem:[#allocation5 + $0x4] ss:$16 sps:$4 sm:$0xff]   ;;  %v1359_v30 = vld [vmem:[#allocation5 + $0xc] ss:$16 sps:$4 sm:$0xff]   ;;  %v1361_v31 = vld [vmem:[#allocation5] ss:$16 sps:$4 sm:$0xff]  }
  0x71   : > { %510 = vmatpush1.bf16.msra.mxu0 %v1331_v11  ;;  %553 = vmatpush1.bf16.msra.mxu1 %v1332_v12  ;;  %v1362_v32 = vld [vmem:[#allocation5 + $0x8] ss:$16 sps:$4 sm:$0xff]   ;;  %v288_v33 = vld [vmem:[%s1776_s8] sm:$0xff]  ;;  %v326_v5 = vshrl.u32 %v325_v4, 7  ;;  %s996_s17 = sshll.u32 %s284_s15, 4  ;;  %s1184_s23 = sshll.u32 %s1656_s22, 8  ;;  %s1798_s17 = int_to_ptr.vmem [resolvable:$true] %s996_s17 }
  0x72   : > { %511 = vmatprep.subr.bf16.mxu0 %v1333_v13  ;;  %554 = vmatprep.subr.bf16.mxu1 %v1335_v14  ;;  %v289_v34 = vld [vmem:[%s1776_s8 + $0x8] sm:$0xff]  ;;  %v323_v8 = vld [vmem:[#allocation7] sm:$0xf]  ;;  %s1803_s13 = scalar_lea.hbm %s1851_s5, %s1184_s23  ;;  %s983_s14 = scalar_lea.sflag [#allocation4], %s1770_s7 }
  0x73   : > { %v290_v35 = vpack.c.bf16 %v289_v34, %v288_v33  ;;  %v1363_v36 = vld [vmem:[#allocation8 + $0x78] sm:$0xff]   ;;  %v1367_v40 = vld [vmem:[#allocation8 + $0x70] sm:$0xff]   ;;  %v1371_v44 = vld [vmem:[#allocation8 + $0x68] sm:$0xff]   ;;  %v327_v6 = vsub.s32 0, %v326_v5  ;;  %v335_v7 = vsub.s32 2, %v326_v5  ;;  %v331_v9 = vsub.s32 1, %v326_v5 }
  0x74   : > { %v1364_v37 = vld [vmem:[#allocation8 + $0xf8] sm:$0xff]   ;;  %v1368_v41 = vld [vmem:[#allocation8 + $0xf0] sm:$0xff]   ;;  %v1372_v45 = vld [vmem:[#allocation8 + $0xe8] sm:$0xff]   ;;  %v339_v10 = vsub.s32 3, %v326_v5  ;;  %s1517_s16 = scalar_lea.vmem %s1798_s17, 256  ;;  %p1869_p6 = scmp.ne.s32.totalorder %s1861_s11, 0 }
  0x75   : > { %512 = vmatpush1.bf16.msra.mxu0 %v1337_v15  ;;  %555 = vmatpush1.bf16.msra.mxu1 %v1338_v16  ;;  %v1365_v38 = vld [vmem:[#allocation8 + $0x38] sm:$0xff]   ;;  %v1369_v42 = vld [vmem:[#allocation8 + $0x30] sm:$0xff]   ;;  %v1373_v46 = vld [vmem:[#allocation8 + $0x28] sm:$0xff]   ;;  %v328_v11 = vrot.slane %v323_v8, %v327_v6  ;;  %v336_v12 = vrot.slane %v323_v8, %v335_v7  ;;  %v332_v15 = vrot.slane %v323_v8, %v331_v9  ;;  %p1518_p4 = scmp.ne.s32.totalorder %s1798_s17, %s1517_s16  ;;  %s1602_s22 = smov [#allocation10]  }
  0x76   : > { %513 = vmatprep.subr.bf16.mxu0 %v1339_v17  ;;  %556 = vmatprep.subr.bf16.mxu1 %v1341_v18  ;;  %v1366_v39 = vld [vmem:[#allocation8 + $0xb8] sm:$0xff]   ;;  %v1370_v43 = vld [vmem:[#allocation8 + $0xb0] sm:$0xff]   ;;  %v1374_v47 = vld [vmem:[#allocation8 + $0xa8] sm:$0xff]   ;;  %v340_v16 = vrot.slane %v323_v8, %v339_v10  ;;  %s1521_s28 = sshll.u32 %s1602_s22, 4  ;;  %s1522_s28 = int_to_ptr.vmem [resolvable:$false] %s1521_s28 }
  0x77   : > { %v1375_v48 = vld [vmem:[#allocation8 + $0x60] sm:$0xff]   ;;  %v1379_v52 = vld [vmem:[#allocation8 + $0x58] sm:$0xff]   ;;  %v1383_v56 = vld [vmem:[#allocation8 + $0x50] sm:$0xff]   ;;  %p1519_p12 = pnand %p1518_p4, %p1869_p6  ;;  %s1523_s30 = scalar_lea.vmem %s1522_s28, 512 }
  0x78   : > { %v1376_v49 = vld [vmem:[#allocation8 + $0xe0] sm:$0xff]   ;;  %v1380_v53 = vld [vmem:[#allocation8 + $0xd8] sm:$0xff]   ;;  %v1384_v57 = vld [vmem:[#allocation8 + $0xd0] sm:$0xff]   ;;  %p1524_p5 = scmp.lt.s32.totalorder %s1798_s17, %s1522_s28  ;;  %p1525_p3 = scmp.lt.s32.totalorder %s1523_s30, %s1517_s16 }
  0x79   : > { %514 = vmatpush1.bf16.msra.mxu0 %v1343_v19  ;;  %557 = vmatpush1.bf16.msra.mxu1 %v1344_v20  ;;  %v1377_v50 = vld [vmem:[#allocation8 + $0x20] sm:$0xff]   ;;  %v1381_v54 = vld [vmem:[#allocation8 + $0x18] sm:$0xff]   ;;  %v1385_v58 = vld [vmem:[#allocation8 + $0x10] sm:$0xff]   ;;  %p1520_p0 = pneg %p1519_p12 }
  0x7a   : > { %515 = vmatprep.subr.bf16.mxu0 %v1345_v21  ;;  %558 = vmatprep.subr.bf16.mxu1 %v1347_v22  ;;  %v1378_v51 = vld [vmem:[#allocation8 + $0xa0] sm:$0xff]   ;;  %v1382_v55 = vld [vmem:[#allocation8 + $0x98] sm:$0xff]   ;;  %v1386_v59 = vld [vmem:[#allocation8 + $0x90] sm:$0xff]   ;;  %p1526_p7 = por %p1525_p3, %p1524_p5 }
  0x7b   : > { %v1387_v60 = vld [vmem:[#allocation8 + $0x48] sm:$0xff]   ;;  %v1391_v0 = vld [vmem:[#allocation8 + $0x40] sm:$0xff]  }
  0x7c   : > { %v1388_v61 = vld [vmem:[#allocation8 + $0xc8] sm:$0xff]   ;;  %v1392_v1 = vld [vmem:[#allocation8 + $0xc0] sm:$0xff]   ;;  %p1527_p9 = pnand %p1526_p7, %p1520_p0 }
  0x7d   : > { %516 = vmatpush1.bf16.msra.mxu0 %v1349_v23  ;;  %559 = vmatpush1.bf16.msra.mxu1 %v1350_v24  ;;  %v1389_v62 = vld [vmem:[#allocation8 + $0x8] sm:$0xff]   ;;  %v1393_v2 = vld [vmem:[#allocation8] sm:$0xff]  }
  0x7e   : > { %517 = vmatprep.subr.bf16.mxu0 %v1351_v25  ;;  %560 = vmatprep.subr.bf16.mxu1 %v1353_v26  ;;  %v1390_v63 = vld [vmem:[#allocation8 + $0x88] sm:$0xff]   ;;  %v1394_v3 = vld [vmem:[#allocation8 + $0x80] sm:$0xff]  }
  0x81   : > { %518 = vmatpush1.bf16.msra.mxu0 %v1355_v27  ;;  %561 = vmatpush1.bf16.msra.mxu1 %v1356_v28 }
  0x82   : > { %519 = vmatprep.subr.bf16.mxu0 %v1357_v29  ;;  %562 = vmatprep.subr.bf16.mxu1 %v1359_v30 }
  0x85   : > { %520 = vmatpush1.bf16.msra.mxu0 %v1361_v31  ;;  %563 = vmatpush1.bf16.msra.mxu1 %v1362_v32 }
  0x86   : > { %1185 = vmatprep.subr.bf16.mxu0 %v1363_v36  ;;  %1207 = vmatprep.subr.bf16.mxu1 %v1364_v37 }
  0x88   : > { %538 = vmatmul.mubr.bf16.vlgmr.msra.gmra.mxu0 %v290_v35  ;;  %581 = vmatmul.mubr.bf16.vlgmr.msra.gmra.mxu1 %v290_v35 }
  0x89   : > { %1186 = vmatpush3.bf16.msra.mxu0 %v1365_v38  ;;  %1208 = vmatpush3.bf16.msra.mxu1 %v1366_v39 }
  0x8a   : > { %1187 = vmatprep.subr.bf16.mxu0 %v1367_v40  ;;  %1209 = vmatprep.subr.bf16.mxu1 %v1368_v41 }
  0x8d   : > { %1188 = vmatpush3.bf16.msra.mxu0 %v1369_v42  ;;  %1210 = vmatpush3.bf16.msra.mxu1 %v1370_v43 }
  0x8e   : > { %1189 = vmatprep.subr.bf16.mxu0 %v1371_v44  ;;  %1211 = vmatprep.subr.bf16.mxu1 %v1372_v45 }
  0x91   : > { %1190 = vmatpush3.bf16.msra.mxu0 %v1373_v46  ;;  %1212 = vmatpush3.bf16.msra.mxu1 %v1374_v47 }
  0x92   : > { %1191 = vmatprep.subr.bf16.mxu0 %v1375_v48  ;;  %1213 = vmatprep.subr.bf16.mxu1 %v1376_v49 }
  0x95   : > { %1192 = vmatpush3.bf16.msra.mxu0 %v1377_v50  ;;  %1214 = vmatpush3.bf16.msra.mxu1 %v1378_v51 }
  0x96   : > { %1193 = vmatprep.subr.bf16.mxu0 %v1379_v52  ;;  %1215 = vmatprep.subr.bf16.mxu1 %v1380_v53 }
  0x99   : > { %1194 = vmatpush3.bf16.msra.mxu0 %v1381_v54  ;;  %1216 = vmatpush3.bf16.msra.mxu1 %v1382_v55 }
  0x9a   : > { %1195 = vmatprep.subr.bf16.mxu0 %v1383_v56  ;;  %1217 = vmatprep.subr.bf16.mxu1 %v1384_v57 }
  0x9d   : > { %1196 = vmatpush3.bf16.msra.mxu0 %v1385_v58  ;;  %1218 = vmatpush3.bf16.msra.mxu1 %v1386_v59 }
  0x9e   : > { %1197 = vmatprep.subr.bf16.mxu0 %v1387_v60  ;;  %1219 = vmatprep.subr.bf16.mxu1 %v1388_v61 }
  0xa1   : > { %1198 = vmatpush3.bf16.msra.mxu0 %v1389_v62  ;;  %1220 = vmatpush3.bf16.msra.mxu1 %v1390_v63 }
  0xa2   : > { %1199 = vmatprep.subr.bf16.mxu0 %v1391_v0  ;;  %1221 = vmatprep.subr.bf16.mxu1 %v1392_v1 }
  0xa5   : > { %1200 = vmatpush3.bf16.msra.mxu0 %v1393_v2  ;;  %1222 = vmatpush3.bf16.msra.mxu1 %v1394_v3 }
 0x148   : > { %v539_v13 = vpop.f32.mrf.mxu0  ;;  %v582_v14 = vpop.f32.mrf.mxu1 }
 0x149   : > { %v540_v17 = vadd.f32 %v539_v13, %v328_v11  ;;  %v583_v18 = vadd.f32 %v582_v14, %v336_v12  ;;  %v1145_v13 = vld [vmem:[%s1850_s4] ss:$0 sm:$0xff] }
 0x14a   : > { %v541_v19 = vpop.f32.mrf.mxu0  ;;  %v584_v20 = vpop.f32.mrf.mxu1 }
 0x14b   : > { %v599_v21 = vmul.f32 0.70710677, %v540_v17  ;;  %v601_v22 = vmul.f32 0.70710677, %v583_v18  ;;  %v542_v23 = vadd.f32 %v541_v19, %v332_v15  ;;  %v585_v24 = vadd.f32 %v584_v20, %v340_v16 }
 0x14c   : > { %v543_v25 = vpop.f32.mrf.mxu0  ;;  %v586_v26 = vpop.f32.mrf.mxu1  ;;  %v591_v45 = vmul.f32 0.5, %v540_v17  ;;  %v593_v63 = vmul.f32 0.5, %v583_v18 }
 0x14d   : > { %v544_v27 = vadd.f32 %v543_v25, %v328_v11  ;;  %v587_v28 = vadd.f32 %v586_v26, %v336_v12  ;;  %1395 = verf.f32 %v599_v21  ;;  %v600_v29 = vmul.f32 0.70710677, %v542_v23 }
 0x14e   : > { %v545_v30 = vpop.f32.mrf.mxu0  ;;  %v588_v31 = vpop.f32.mrf.mxu1  ;;  %1397 = verf.f32 %v601_v22  ;;  %v602_v32 = vmul.f32 0.70710677, %v585_v24  ;;  %v592_v46 = vmul.f32 0.5, %v542_v23  ;;  %v594_v59 = vmul.f32 0.5, %v585_v24 }
 0x14f   : > { %v603_v33 = vmul.f32 0.70710677, %v544_v27  ;;  %1399 = verf.f32 %v600_v29  ;;  %v605_v34 = vmul.f32 0.70710677, %v587_v28  ;;  %v546_v35 = vadd.f32 %v545_v30, %v332_v15 }
 0x150   : > { %v589_v36 = vadd.f32 %v588_v31, %v340_v16  ;;  %1401 = verf.f32 %v602_v32  ;;  %v595_v52 = vmul.f32 0.5, %v544_v27  ;;  %v597_v56 = vmul.f32 0.5, %v587_v28 }
 0x151   : > { %1403 = verf.f32 %v603_v33  ;;  %v604_v37 = vmul.f32 0.70710677, %v546_v35  ;;  %v596_v57 = vmul.f32 0.5, %v546_v35 }
 0x152   : > { %1405 = verf.f32 %v605_v34  ;;  %v606_v38 = vmul.f32 0.70710677, %v589_v36  ;;  %v598_v61 = vmul.f32 0.5, %v589_v36 }
 0x153   : > { %1407 = verf.f32 %v604_v37 }
 0x154   : > { %1409 = verf.f32 %v606_v38 }
 0x15a   : > { %v1396_v39 = vpop.eup %1395 }
 0x15b   : > { %v1398_v40 = vpop.eup %1397  ;;  %v615_v50 = vadd.f32 1.0, %v1396_v39 }
 0x15c   : > { %v1400_v41 = vpop.eup %1399  ;;  %v617_v55 = vadd.f32 1.0, %v1398_v40 }
 0x15d   : > { %v1402_v42 = vpop.eup %1401  ;;  %v616_v47 = vadd.f32 1.0, %v1400_v41  ;;  %v623_v3 = vmul.f32 %v615_v50, %v591_v45 }
 0x15e   : > { %v1404_v43 = vpop.eup %1403  ;;  %v618_v51 = vadd.f32 1.0, %v1402_v42  ;;  %v625_v6 = vmul.f32 %v617_v55, %v593_v63 }
 0x15f   : > { %v1406_v44 = vpop.eup %1405  ;;  %v619_v48 = vadd.f32 1.0, %v1404_v43  ;;  %v624_v0 = vmul.f32 %v616_v47, %v592_v46 }
 0x160   : > { %v1408_v49 = vpop.eup %1407  ;;  %v621_v53 = vadd.f32 1.0, %v1406_v44  ;;  %v626_v4 = vmul.f32 %v618_v51, %v594_v59 }
 0x161   : > { %v1410_v54 = vpop.eup %1409  ;;  %v620_v58 = vadd.f32 1.0, %v1408_v49  ;;  %v627_v60 = vmul.f32 %v619_v48, %v595_v52 }
 0x162   : > { %v622_v62 = vadd.f32 1.0, %v1410_v54  ;;  %v629_v1 = vmul.f32 %v621_v53, %v597_v56 }
 0x163   : > { %v628_v2 = vmul.f32 %v620_v58, %v596_v57  ;;  %v631_v8 = vpack.c.bf16 %v627_v60, %v623_v3 }
 0x164   : > { %v630_v5 = vmul.f32 %v622_v62, %v598_v61  ;;  %v633_v10 = vpack.c.bf16 %v629_v1, %v625_v6 }
 0x165   : > { %v632_v7 = vpack.c.bf16 %v628_v2, %v624_v0 }
 0x166   : > { %v634_v9 = vpack.c.bf16 %v630_v5, %v626_v4 }
 0x167   : > { %930 = vmatprep.mubr.bf16.mxu0 %v632_v7 }
 0x168   : > { %971 = vmatprep.mubr.bf16.mxu1 %v634_v9  ;;  %931 = vmatmul.mubr.bf16.vlgmr.msra.gmra.mxu0 %v631_v8 }
 0x169   : > { %972 = vmatmul.mubr.bf16.vlgmr.msra.gmra.mxu1 %v633_v10 }
 0x228   : > { %v1201_v11 = vpop.f32.mrf.mxu0 }
 0x229   : > { %v1223_v12 = vpop.f32.mrf.mxu1 }
 0x22a   : > { %v1202_v14 = vpop.f32.mrf.mxu0 }
 0x22b   : > { %v1203_v15 = vadd.f32 %v1202_v14, %v1201_v11  ;;  %v1224_v16 = vpop.f32.mrf.mxu1 }
 0x22c   : > { %v1204_v17 = vpop.f32.mrf.mxu0  ;;  %v1225_v19 = vadd.f32 %v1224_v16, %v1223_v12 }
 0x22d   : > { %v933_v18 = vadd.f32 %v1203_v15, %v1145_v13  ;;  %v1226_v20 = vpop.f32.mrf.mxu1 }
 0x22e   : > { %v1205_v21 = vpop.f32.mrf.mxu0 }
 0x22f   : > { %v974_v22 = vadd.f32 %v1225_v19, %v933_v18  ;;  %v1206_v23 = vadd.f32 %v1205_v21, %v1204_v17  ;;  %v1227_v24 = vpop.f32.mrf.mxu1 }
 0x230   : > { %v1228_v26 = vadd.f32 %v1227_v24, %v1226_v20 }
 0x231   : > { %980 = vst [vmem:[%s284_s15] sm:$0xff] %v974_v22  ;;  %v936_v25 = vadd.f32 %v1206_v23, %v1145_v13 }
 0x233   : > { %v977_v27 = vadd.f32 %v1228_v26, %v936_v25 }
 0x235   : > { %981 = vst [vmem:[%s284_s15 + $0x8] sm:$0xff] %v977_v27 }
 0x236   : > { %1530 = shalt.err (!%p1527_p9)
}
 0x237   : > { %s1531_s9 = scalar_lea.hbm %s1803_s13, 256  ;;  %s1535_s24 = scalar_lea.hbm %s1851_s5, 512 }
 0x238   : > { %p1532_p1 = scmp.ne.s32.totalorder %s1803_s13, %s1531_s9  ;;  %p1536_p11 = scmp.lt.s32.totalorder %s1803_s13, %s1851_s5 }
 0x239   : > { %p1537_p13 = scmp.lt.s32.totalorder %s1535_s24, %s1531_s9 }
 0x23a   : > { %p1533_p8 = pnand %p1532_p1, %p1869_p6 }
 0x23b   : > { %p1538_p2 = por %p1537_p13, %p1536_p11 }
 0x23c   : > { %p1534_p10 = pneg %p1533_p8 }
 0x23e   : > { %p1539_p4 = pnand %p1538_p2, %p1534_p10 }
 0x240   : > { %1542 = shalt.err (!%p1539_p4)
}
 0x241   : > { %s1603_s23 = smov 128   ;;  %s1604_s27 = smov 8  }
 0x242   : > { %1243 = dma.vmem_to_hbm [thread:$0]  (%p1869_p6), %s1798_s17, 256, %s1803_s13, %s983_s14, %s1603_s23, %s1603_s23, %s1604_s27  }
 0x243 PF: > { %s1011_s29 = sand.u32 1, %s1577_s18   ;;  %p1870_p12 = scmp.ne.s32.totalorder %s1857_s25, 0 }
 0x244   : > { %p1871_p0 = scmp.ge.s32.totalorder %s1589_s21, 2  ;;  %s1012_s16 = scalar_lea.sflag [#allocation4], %s1011_s29 }
 0x246   : > { %p1260_p5 = pnand %p1871_p0, %p1870_p12 }
 0x248   : > { %p1261_p3 = pneg %p1260_p5 }
 0x24a   : > { %1572 = dma.done.wait (%p1261_p3), %s1012_s16, 256  }
 0x24b   : > { %1574 = vsyncadd (%p1261_p3), %s1012_s16, 4294967040  ;;  %p20_p7 = scmp.ge.s32.totalorder %s1715_s6, 4   ;;  %s1872_s18 = smov %s1581_s19 }
 0x24c   : > { %s1873_s19 = smov %s1585_s20  ;;  %s1874_s20 = smov %s1725_s10 }
 0x24d   : > { %s1875_s21 = smov %s1715_s6  ;;  %22 = sbr.rel (!%p20_p7) target bundleno = 7 (0x7), region = 97 }
 0x252   :  { %1017 = vsyncpa [#allocation3], 1 }
 0x253   :  { %1019 = vsyncpa [#allocation3 + $0x1], 1 }
 0x254   :  { %1020 = vsyncpa [#allocation6], 1 }
 0x255   :  { %1021 = vsyncpa [#allocation9], 1 }
 0x256   :  { %1022 = vsyncpa [#allocation4], 1 }
 0x257   :  { %1024 = vsyncpa [#allocation4 + $0x1], 1 }

</bundles_post_ra>
